<compile_context>
chip_gen: v7x
topology: tpu7x:2x2x1
jax: 0.10.0
libtpu: 0.0.40
codegen_flags: <defaults>
</compile_context>

<pallas_src>
import functools

import jax
import jax.numpy as jnp
from jax import lax
from jax.experimental import pallas as pl
from jax.experimental.pallas import tpu as pltpu

FACTORS = [1, 1, 1, 1, 1 / 2, 1 / 4, 1 / 8]
EPS = 1e-8
LEAKY_SLOPE = 0.2
LANES = 128
SUBLANES = 8
VMEM_LIMIT_BYTES = 48 * 1024 * 1024


def _round_up(x, m):
    return ((x + m - 1) // m) * m


# ---------------------------------------------------------------------------
# Kernel 1: fused (optional PixelNorm) -> x @ w + b -> (optional LeakyReLU)
# ---------------------------------------------------------------------------
def _matmul_bias_kernel(x_ref, w_ref, b_ref, o_ref, *, pre_pixelnorm, true_k,
                        post_leaky):
    x = x_ref[...]
    if pre_pixelnorm:
        xf = x.astype(jnp.float32)                      # stats in f32
        x = xf * lax.rsqrt(jnp.sum(xf * xf, axis=-1, keepdims=True) / true_k + EPS)
    y = jnp.dot(x.astype(jnp.bfloat16), w_ref[...],
                preferred_element_type=jnp.float32)
    y = y + b_ref[...]
    if post_leaky:
        y = jnp.where(y >= 0.0, y, LEAKY_SLOPE * y)
    o_ref[...] = y.astype(o_ref.dtype)


def _pick_tile_m(M, K, itemsize, budget_bytes=4 << 20, cap=8192):
    """Row tile: multiple of 8, a few MiB of input block, capped at `cap` rows."""
    tm = budget_bytes // max(1, K * itemsize)
    tm = max(SUBLANES, min(cap, tm))
    tm -= tm % SUBLANES
    tm = min(tm, _round_up(M, SUBLANES))
    return max(SUBLANES, tm)


def matmul_bias(x, w_packed, b_packed, *, pre_pixelnorm=False, post_leaky=False,
                out_dtype=jnp.float32, tile_m=8192):
    """y = act(pixelnorm?(x) @ w_packed + b_packed); w_packed is pre-scaled bf16."""
    M, K = x.shape
    N = w_packed.shape[1]
    tm = _pick_tile_m(M, K, x.dtype.itemsize, cap=tile_m)
    Mp = _round_up(M, tm)
    xp = x if Mp == M else jnp.pad(x, ((0, Mp - M), (0, 0)))

    kernel = functools.partial(_matmul_bias_kernel, pre_pixelnorm=pre_pixelnorm,
                               true_k=float(K), post_leaky=post_leaky)
    out = pl.pallas_call(
        kernel,
        out_shape=jax.ShapeDtypeStruct((Mp, N), out_dtype),
        grid=(Mp // tm,),
        in_specs=[pl.BlockSpec((tm, K), lambda i: (i, 0)),
                  pl.BlockSpec((K, N), lambda i: (0, 0)),
                  pl.BlockSpec((1, N), lambda i: (0, 0))],
        out_specs=pl.BlockSpec((tm, N), lambda i: (i, 0)),
        compiler_params=pltpu.CompilerParams(
            dimension_semantics=("parallel",),
            vmem_limit_bytes=VMEM_LIMIT_BYTES),
    )(xp, w_packed, b_packed)
    return out if Mp == M else out[:M]


# ---------------------------------------------------------------------------
# Kernel 2: WSConv2D 3x3 (+ LeakyReLU + PixelNorm), row-tiled with halo blocks
# ---------------------------------------------------------------------------
def _conv3x3_kernel(main_ref, halo_ref, w_ref, b_ref, o_ref, win_ref, *,
                    th, wo, fuse_dw, post_leaky, post_pixelnorm):
    """3x3 stride-1 conv of a (th+2, wo+2, Cin) window -> (th, wo, Cout)."""
    cin = main_ref.shape[-1]
    cout = o_ref.shape[-1]
    # Assemble the window once in VMEM: th pipelined rows + 2 halo rows that come
    # from a second, tiny block of the SAME HBM array (no HBM duplication).
    win_ref[0:th] = main_ref[...]
    win_ref[th:th + 2] = halo_ref[...]

    acc = jnp.zeros((th * wo, cout), jnp.float32)
    if fuse_dw:
        # Cin % 128 == 0: lane-aligned concat of the 3 width taps -> K = 3*Cin,
        # 3 MXU calls instead of 9 (fills the 256-deep MXU on v6e/v7x).
        col = jnp.concatenate(
            [win_ref[:, dw:dw + wo, :] for dw in range(3)], axis=-1)
        for dh in range(3):
            patch = col[dh:dh + th].reshape(th * wo, 3 * cin)   # free: wo % 8 == 0
            acc = acc + jnp.dot(patch, w_ref[dh],
                                preferred_element_type=jnp.float32)
    else:
        for dh in range(3):                                     # static, unrolled taps
            band = win_ref[dh:dh + th]                          # (th, wo+2, cin)
            wk = w_ref[dh]                                      # (3*cin, cout)
            for dw in range(3):
                patch = band[:, dw:dw + wo, :].reshape(th * wo, cin)
                acc = acc + jnp.dot(patch, wk[dw * cin:(dw + 1) * cin],
                                    preferred_element_type=jnp.float32)

    y = acc + b_ref[...]
    if post_leaky:
        y = jnp.where(y >= 0.0, y, LEAKY_SLOPE * y)
    if post_pixelnorm:
        y = y * lax.rsqrt(jnp.mean(y * y, axis=-1, keepdims=True) + EPS)
    o_ref[...] = y.reshape(th, wo, cout).astype(o_ref.dtype)    # free: wo % 8 == 0


def _pick_row_tile(Ho, Wp, Cin, itemsize, budget_bytes=2 << 20):
    """Output-row tile: even (halo blocks are 2 rows), multiple of 8 when tiled,
    sized so the (th, Wp, Cin) input block stays ~budget (in-kernel temporaries
    are a few x that, which keeps us comfortably inside v7x's 64 MiB VMEM)."""
    rows = budget_bytes // max(1, Wp * Cin * itemsize)
    rows = max(SUBLANES, rows - 2)
    rows -= rows % SUBLANES
    if rows >= Ho:
        return _round_up(max(Ho, 1), 2)      # single tile covers the whole height
    return rows


def ws_conv3x3(x_nhwc, w_packed, b_packed, *, padding, post_leaky, post_pixelnorm,
               out_dtype=jnp.bfloat16, row_budget_bytes=2 << 20):
    """WSConv2D 3x3 stride 1.  w_packed: (3, 3*Cin, Cout) bf16 with WS scale folded;
    b_packed: (1, Cout) f32.  Output is bf16 NHWC (consumers are other kernels)."""
    N, H, W, Cin = x_nhwc.shape
    Cout = w_packed.shape[-1]
    Hp, Wp = H + 2 * padding, W + 2 * padding
    Ho, Wo = Hp - 2, Wp - 2
    Wo_pad = _round_up(Wo, SUBLANES)         # free in-kernel reshapes
    Wp_pad = Wo_pad + 2
    th = _pick_row_tile(Ho, Wp_pad, Cin, 2, row_budget_bytes)
    Ho_pad = _round_up(Ho, th)
    num_t = Ho_pad // th
    halo_blk = th // 2                       # block index scale for the 2-row halo

    # Single pad in glue: conv zero-padding + row/col padding for the tiling.
    xp = jnp.pad(x_nhwc.astype(jnp.bfloat16),
                 ((0, 0),
                  (padding, Ho_pad + 2 - H - padding),
                  (padding, Wp_pad - W - padding),
                  (0, 0)))

    kernel = functools.partial(
        _conv3x3_kernel, th=th, wo=Wo_pad, fuse_dw=(Cin % 128 == 0),
        post_leaky=post_leaky, post_pixelnorm=post_pixelnorm)
    out = pl.pallas_call(
        kernel,
        out_shape=jax.ShapeDtypeStruct((N, Ho_pad, Wo_pad, Cout), out_dtype),
        grid=(N, num_t),
        in_specs=[
            # main rows [j*th, (j+1)*th)
            pl.BlockSpec((None, th, Wp_pad, Cin), lambda n, j: (n, j, 0, 0)),
            # 2 halo rows [(j+1)*th, (j+1)*th+2) of the SAME array
            pl.BlockSpec((None, 2, Wp_pad, Cin),
                         lambda n, j: (n, (j + 1) * halo_blk, 0, 0)),
            pl.BlockSpec((3, 3 * Cin, Cout), lambda n, j: (0, 0, 0)),
            pl.BlockSpec((1, Cout), lambda n, j: (0, 0)),
        ],
        out_specs=pl.BlockSpec((None, th, Wo_pad, Cout), lambda n, j: (n, j, 0, 0)),
        scratch_shapes=[pltpu.VMEM((th + 2, Wp_pad, Cin), jnp.bfloat16)],
        compiler_params=pltpu.CompilerParams(
            dimension_semantics=("parallel", "parallel"),
            vmem_limit_bytes=VMEM_LIMIT_BYTES),
    )(xp, xp, w_packed, b_packed)
    if Ho_pad != Ho or Wo_pad != Wo:
        out = out[:, :Ho, :Wo]
    return out


# ---------------------------------------------------------------------------
# Kernel 3: tanh fade-in blend (lane-dense, tiled)
# ---------------------------------------------------------------------------
def _fade_in_kernel(u_ref, g_ref, o_ref, *, alpha):
    o_ref[...] = jnp.tanh(alpha * g_ref[...] + (1.0 - alpha) * u_ref[...])


def fade_in(alpha, upscaled, generated):
    # TODO(synk): the original module's steps>0 path is un-runnable (ConvBlock uses
    # padding=0, so `generated` is spatially smaller than `upscaled`); kept faithful,
    # so this blend cannot be fused into the toRGB epilogue or validated vs PyTorch.
    shape = generated.shape
    total = int(generated.size)
    rows = pl.cdiv(total, LANES)
    tr = min(4096, _round_up(rows, SUBLANES))
    rows_p = _round_up(rows, tr)
    pad = rows_p * LANES - total
    u = jnp.pad(upscaled.astype(jnp.float32).reshape(-1), (0, pad)).reshape(rows_p, LANES)
    g = jnp.pad(generated.astype(jnp.float32).reshape(-1), (0, pad)).reshape(rows_p, LANES)
    kernel = functools.partial(_fade_in_kernel, alpha=float(alpha))
    out = pl.pallas_call(
        kernel,
        out_shape=jax.ShapeDtypeStruct((rows_p, LANES), jnp.float32),
        grid=(rows_p // tr,),
        in_specs=[pl.BlockSpec((tr, LANES), lambda i: (i, 0)),
                  pl.BlockSpec((tr, LANES), lambda i: (i, 0))],
        out_specs=pl.BlockSpec((tr, LANES), lambda i: (i, 0)),
        compiler_params=pltpu.CompilerParams(
            dimension_semantics=("parallel",),
            vmem_limit_bytes=VMEM_LIMIT_BYTES),
    )(u, g)
    return out.reshape(-1)[:total].reshape(shape)


# ---------------------------------------------------------------------------
# One-time parameter packing (review: hoist scale-fold / transpose / bf16 cast)
# ---------------------------------------------------------------------------
def _pack_conv(w_oihw, b, scale):
    cout, cin = w_oihw.shape[0], w_oihw.shape[1]
    w = jnp.transpose(w_oihw.astype(jnp.float32) * scale, (2, 3, 1, 0))  # (dh, dw, cin, cout)
    w = w.reshape(3, 3 * cin, cout).astype(jnp.bfloat16)                 # K index = dw*cin + c
    return {"w": w, "b": b.astype(jnp.float32).reshape(1, cout)}


def _pack_rgb(w, b, cin):
    cout = w.shape[0]
    scale = (2.0 / cin) ** 0.5
    wm = (w.reshape(cout, cin).T.astype(jnp.float32) * scale).astype(jnp.bfloat16)
    return {"w": wm, "b": b.astype(jnp.float32).reshape(1, cout)}


def prepare_params(params):
    C = params["num_channels"]
    prep = {"num_channels": C}
    wt = jnp.transpose(params["init"]["wt"].astype(jnp.float32), (0, 2, 3, 1))
    prep["init"] = {
        "wt": wt.reshape(-1, 16 * C).astype(jnp.bfloat16),              # (Z, h*w*C)
        "bt": jnp.tile(params["init"]["bt"].astype(jnp.float32), 16).reshape(1, 16 * C),
        "conv": _pack_conv(params["init"]["w1"], params["init"]["b1"],
                           (2.0 / (C * 9)) ** 0.5),
    }
    prep["rgb"] = [_pack_rgb(params["rgb"][0]["w"], params["rgb"][0]["b"], C)]
    prep["blocks"] = []
    for i, bp in enumerate(params["blocks"]):
        cin = bp["w1"].shape[1]
        s = (2.0 / (cin * 9)) ** 0.5
        prep["blocks"].append({"c1": _pack_conv(bp["w1"], bp["b1"], s),
                               "c2": _pack_conv(bp["w2"], bp["b2"], s)})
        cout = bp["w1"].shape[0]
        prep["rgb"].append(_pack_rgb(params["rgb"][i + 1]["w"],
                                     params["rgb"][i + 1]["b"], cout))
    return prep


# ---------------------------------------------------------------------------
# Module-level wrappers (glue)
# ---------------------------------------------------------------------------
def to_rgb(x_nhwc, rgb_prep, out_dtype=jnp.float32):
    """WSConv2D 1x1 -> img_channels as a matmul over channels (output is exactly
    3 columns wide: no 128-lane pad -> ~42x less HBM writeback)."""
    N, H, W, Cin = x_nhwc.shape
    y = matmul_bias(x_nhwc.reshape(N * H * W, Cin), rgb_prep["w"], rgb_prep["b"],
                    post_leaky=False, out_dtype=out_dtype)
    return y.reshape(N, H, W, -1)


def generator_forward(prep, x_nchw, alpha, steps):
    """Generator.forward. Input x: (N, z_dim, 1, 1) NCHW; output NCHW image."""
    N, Z = x_nchw.shape[0], x_nchw.shape[1]
    C = prep["num_channels"]

    # initial: PixelNorm -> ConvTranspose2d(z, 4x4) -> LeakyReLU  (fused matmul)
    z2d = x_nchw.reshape(N, Z)
    x = matmul_bias(z2d, prep["init"]["wt"], prep["init"]["bt"],
                    pre_pixelnorm=True, post_leaky=True, out_dtype=jnp.bfloat16)
    x = x.reshape(N, 4, 4, C)                                           # NHWC, bf16

    # initial: WSConv2D 3x3 pad 1 -> LeakyReLU -> PixelNorm  (fused conv kernel)
    ic = prep["init"]["conv"]
    x = ws_conv3x3(x, ic["w"], ic["b"], padding=1,
                   post_leaky=True, post_pixelnorm=True)

    if steps == 0:
        rgb = to_rgb(x, prep["rgb"][0], out_dtype=jnp.float32)
        return jnp.transpose(rgb, (0, 3, 1, 2))                         # back to NCHW

    upscaled = None
    for step in range(steps):
        # TODO(synk): fold the 2x nearest upsample into the conv input index math;
        # kept as glue because the original steps>0 path is un-runnable (fade_in
        # shape mismatch) and cannot be validated against PyTorch.
        upscaled = jnp.repeat(jnp.repeat(x, 2, axis=1), 2, axis=2)
        bp = prep["blocks"][step]
        x = ws_conv3x3(upscaled, bp["c1"]["w"], bp["c1"]["b"], padding=0,
                       post_leaky=True, post_pixelnorm=True)
        x = ws_conv3x3(x, bp["c2"]["w"], bp["c2"]["b"], padding=0,
                       post_leaky=True, post_pixelnorm=True)

    final_upscaled = to_rgb(upscaled, prep["rgb"][steps - 1])
    final_output = to_rgb(x, prep["rgb"][steps])
    out = fade_in(alpha, final_upscaled, final_output)
    return jnp.transpose(out, (0, 3, 1, 2))


# ---------------------------------------------------------------------------
# Deterministic parameter initialization (shapes as in Generator.__init__)
# ---------------------------------------------------------------------------
def init_params(key, z_dim, num_channels, img_channels=3):
    keys = iter(jax.random.split(key, 64))
    p = {"num_channels": num_channels}
    p["init"] = {
        "wt": 0.1 * jax.random.normal(next(keys), (z_dim, num_channels, 4, 4), jnp.float32),
        "bt": 0.1 * jax.random.normal(next(keys), (num_channels,), jnp.float32),
        "w1": jax.random.normal(next(keys), (num_channels, num_channels, 3, 3), jnp.float32),
        "b1": jnp.zeros((num_channels,), jnp.float32),
    }
    p["rgb"] = [{"w": jax.random.normal(next(keys), (img_channels, num_channels, 1, 1), jnp.float32),
                 "b": jnp.zeros((img_channels,), jnp.float32)}]
    p["blocks"] = []
    for i in range(len(FACTORS) - 1):
        cin = int(num_channels * FACTORS[i])
        cout = int(num_channels * FACTORS[i + 1])
        p["blocks"].append({
            "w1": jax.random.normal(next(keys), (cout, cin, 3, 3), jnp.float32),
            "b1": jnp.zeros((cout,), jnp.float32),
            "w2": jax.random.normal(next(keys), (cout, cin, 3, 3), jnp.float32),
            "b2": jnp.zeros((cout,), jnp.float32),
        })
        p["rgb"].append({"w": jax.random.normal(next(keys), (img_channels, cout, 1, 1), jnp.float32),
                         "b": jnp.zeros((img_channels,), jnp.float32)})
    return p


# ---------------------------------------------------------------------------
# Pure-JAX reference (steps == 0 path) for correctness check
# ---------------------------------------------------------------------------
def reference_forward_steps0(params, x_nchw):
    C = params["num_channels"]
    x = x_nchw / jnp.sqrt(jnp.mean(x_nchw ** 2, axis=1, keepdims=True) + EPS)
    y = jnp.einsum("nz,zchw->nchw", x[:, :, 0, 0], params["init"]["wt"])
    y = y + params["init"]["bt"][None, :, None, None]
    y = jnp.where(y >= 0, y, LEAKY_SLOPE * y)
    s1 = (2.0 / (C * 9)) ** 0.5
    y = lax.conv_general_dilated(y * s1, params["init"]["w1"], (1, 1), ((1, 1), (1, 1)),
                                 dimension_numbers=("NCHW", "OIHW", "NCHW"))
    y = y + params["init"]["b1"][None, :, None, None]
    y = jnp.where(y >= 0, y, LEAKY_SLOPE * y)
    y = y / jnp.sqrt(jnp.mean(y ** 2, axis=1, keepdims=True) + EPS)
    srgb = (2.0 / C) ** 0.5
    y = lax.conv_general_dilated(y * srgb, params["rgb"][0]["w"], (1, 1), ((0, 0), (0, 0)),
                                 dimension_numbers=("NCHW", "OIHW", "NCHW"))
    y = y + params["rgb"][0]["b"][None, :, None, None]
    return y


if __name__ == "__main__":
    key = jax.random.PRNGKey(0)
    kp, kz = jax.random.split(key)
    z_dim, num_channels, batch = 32, 32, 2
    params = init_params(kp, z_dim, num_channels, img_channels=3)
    prep = prepare_params(params)                       # one-time weight packing
    z = jax.random.normal(kz, (batch, z_dim, 1, 1), jnp.float32)

    out = generator_forward(prep, z, alpha=0.5, steps=0)
    out = jax.block_until_ready(out)
    assert out.shape == (batch, 3, 4, 4), out.shape

    ref = jax.block_until_ready(reference_forward_steps0(params, z))
    max_err = float(jnp.max(jnp.abs(out - ref)))
    assert jnp.allclose(out, ref, atol=5e-2, rtol=5e-2), max_err

    print("KERNEL_OK")
</pallas_src>

<mosaic_0001>
module attributes {stable_mosaic.version = 11 : i64} {
  func.func @_matmul_bias_kernel(%arg0: i32, %arg1: memref<8x32xf32, #tpu.memory_space<vmem>>, %arg2: memref<32x512xbf16, #tpu.memory_space<vmem>>, %arg3: memref<1x512xf32, #tpu.memory_space<vmem>>, %arg4: memref<8x512xbf16, #tpu.memory_space<vmem>>) attributes {dimension_semantics = [#tpu.dimension_semantics<parallel>], iteration_bounds = array<i64: 1>, scalar_prefetch = 0 : i64, scratch_operands = 0 : i64, tpu.core_type = #tpu.core_type<tc>, window_params = [{transform_indices = @transform_0, window_bounds = array<i64: 8, 32>}, {pipeline_mode = #tpu.pipeline_mode<synchronous>, transform_indices = @transform_1, window_bounds = array<i64: 32, 512>}, {pipeline_mode = #tpu.pipeline_mode<synchronous>, transform_indices = @transform_2, window_bounds = array<i64: 1, 512>}, {transform_indices = @transform_3, window_bounds = array<i64: 8, 512>}]} {
    %c0 = arith.constant 0 : index
    %c0_0 = arith.constant 0 : index
    %0 = vector.load %arg1[%c0, %c0_0] : memref<8x32xf32, #tpu.memory_space<vmem>>, vector<8x32xf32>
    %1 = arith.mulf %0, %0 : vector<8x32xf32>
    %cst = arith.constant dense<0.000000e+00> : vector<8xf32>
    %2 = vector.multi_reduction <add>, %1, %cst [1] : vector<8x32xf32> to vector<8xf32>
    %3 = vector.shape_cast %2 : vector<8xf32> to vector<8x1xf32>
    %cst_1 = arith.constant 3.200000e+01 : f32
    %4 = vector.broadcast %cst_1 : f32 to vector<8x1xf32>
    %5 = arith.divf %3, %4 : vector<8x1xf32>
    %cst_2 = arith.constant 9.99999993E-9 : f32
    %6 = vector.broadcast %cst_2 : f32 to vector<8x1xf32>
    %7 = arith.addf %5, %6 : vector<8x1xf32>
    %8 = math.rsqrt %7 : vector<8x1xf32>
    %9 = vector.broadcast %8 : vector<8x1xf32> to vector<8x32xf32>
    %10 = arith.mulf %0, %9 : vector<8x32xf32>
    %11 = arith.truncf %10 : vector<8x32xf32> to vector<8x32xbf16>
    %c0_3 = arith.constant 0 : index
    %c0_4 = arith.constant 0 : index
    %12 = vector.load %arg2[%c0_3, %c0_4] : memref<32x512xbf16, #tpu.memory_space<vmem>>, vector<32x512xbf16>
    %cst_5 = arith.constant dense<0.000000e+00> : vector<8x512xf32>
    %13 = tpu.matmul %11, %12, %cst_5 {dimension_numbers = #tpu.dot_dimension_numbers<[1], [0], [0], [1], [0, 0, 1, 1], [], []>} : vector<8x32xbf16>, vector<32x512xbf16>, vector<8x512xf32> -> vector<8x512xf32>
    %c0_6 = arith.constant 0 : index
    %c0_7 = arith.constant 0 : index
    %14 = vector.load %arg3[%c0_6, %c0_7] : memref<1x512xf32, #tpu.memory_space<vmem>>, vector<1x512xf32>
    %15 = vector.broadcast %14 : vector<1x512xf32> to vector<8x512xf32>
    %16 = arith.addf %13, %15 : vector<8x512xf32>
    %cst_8 = arith.constant 0.000000e+00 : f32
    %17 = vector.broadcast %cst_8 : f32 to vector<8x512xf32>
    %18 = arith.cmpf oge, %16, %17 : vector<8x512xf32>
    %cst_9 = arith.constant 2.000000e-01 : f32
    %19 = vector.broadcast %cst_9 : f32 to vector<8x512xf32>
    %20 = arith.mulf %19, %16 : vector<8x512xf32>
    %21 = arith.select %18, %16, %20 : vector<8x512xi1>, vector<8x512xf32>
    %22 = arith.truncf %21 : vector<8x512xf32> to vector<8x512xbf16>
    %c0_10 = arith.constant 0 : index
    %c0_11 = arith.constant 0 : index
    %23 = vector.load %arg4[%c0_10, %c0_11] : memref<8x512xbf16, #tpu.memory_space<vmem>>, vector<8x512xbf16>
    tpu.vector_store %arg4[%c0_10, %c0_11], %22 {strides = array<i32>} : memref<8x512xbf16, #tpu.memory_space<vmem>>, vector<8x512xbf16>,
    return
  }
  func.func @transform_0(%arg0: i32) -> (i32, i32) {
    %c0_i32 = arith.constant 0 : i32
    %c0_i32_0 = arith.constant 0 : i32
    return %arg0, %c0_i32 : i32, i32
  }
  func.func @transform_1(%arg0: i32) -> (i32, i32) {
    %c0_i32 = arith.constant 0 : i32
    %c0_i32_0 = arith.constant 0 : i32
    %c0_i32_1 = arith.constant 0 : i32
    return %c0_i32, %c0_i32_0 : i32, i32
  }
  func.func @transform_2(%arg0: i32) -> (i32, i32) {
    %c0_i32 = arith.constant 0 : i32
    %c0_i32_0 = arith.constant 0 : i32
    %c0_i32_1 = arith.constant 0 : i32
    return %c0_i32, %c0_i32_0 : i32, i32
  }
  func.func @transform_3(%arg0: i32) -> (i32, i32) {
    %c0_i32 = arith.constant 0 : i32
    %c0_i32_0 = arith.constant 0 : i32
    return %arg0, %c0_i32 : i32, i32
  }
}

</mosaic_0001>

<bundles_post_ra>
// kernel: tpu_custom_call.1
= control target key start
LH: loop header
LB: loop body
LE: loop exit
PB: predicated region body
PF: predicated region fallthrough
CT: control target
= control target key end

     0   :  { %8 = vsyncpa [#allocation3], 0  ;;  %s436_s0 = inlined_call_operand.hbm [shape: f32[8,32], index: 0, kind: input, shape index: {}]   ;;  %s437_s1 = inlined_call_operand.hbm [shape: bf16[32,512], index: 1, kind: input, shape index: {}]   ;;  %s438_s2 = inlined_call_operand.vmem [shape: f32[1,512], index: 2, kind: input, shape index: {}]   ;;  %s439_s3 = inlined_call_operand.hbm [shape: bf16[8,512], index: 3, kind: output, shape index: {}]  }
   0x1   :  { %9 = vsyncpa [#allocation6], 0 }
   0x2   :  { %10 = vsyncpa [#allocation4], 0  ;;  %s361_s12 = smov [#allocation2]   ;;  %s362_s14 = smov [#allocation5]  }
   0x3   :  { %s17_s13 = sshll.u32 %s361_s12, 4  ;;  %s26_s15 = sshll.u32 %s362_s14, 4  ;;  %s18_s13 = int_to_ptr.vmem [resolvable:$true] %s17_s13  ;;  %s387_s15 = int_to_ptr.vmem [resolvable:$true] %s26_s15 }
   0x4   :  { %s289_s18 = scalar_lea.hbm %s436_s0, 128 }
   0x5   :  { %p290_p0 = scmp.ne.s32.totalorder %s436_s0, %s289_s18  ;;  %p293_p1 = scmp.lt.u32.totalorder %s289_s18, %s436_s0 }
   0x7   :  { %p295_p2 = pnand %p293_p1, %p290_p0 }
   0x9   :  { %298 = shalt.err (!%p295_p2)
}
   0xa   :  { %s299_s23 = scalar_lea.vmem %s18_s13, 128  ;;  %p304_p4 = scmp.lt.s32.totalorder %s18_s13, %s18_s13 }
   0xb   :  { %p300_p3 = scmp.ne.s32.totalorder %s18_s13, %s299_s23  ;;  %p305_p5 = scmp.lt.s32.totalorder %s299_s23, %s299_s23 }
   0xd   :  { %p306_p6 = por %p305_p5, %p304_p4 }
   0xf   :  { %p307_p7 = pnand %p306_p6, %p300_p3 }
  0x11   :  { %310 = shalt.err (!%p307_p7)
}
  0x12   :  { %20 = dma.hbm_to_vmem [thread:$0]  %s436_s0, 128, %s18_s13, [#allocation3]  }
  0x13   :  { %s311_s28 = scalar_lea.hbm %s437_s1, 1024 }
  0x14   :  { %p312_p8 = scmp.ne.s32.totalorder %s437_s1, %s311_s28  ;;  %p315_p9 = scmp.lt.u32.totalorder %s311_s28, %s437_s1 }
  0x16   :  { %p317_p10 = pnand %p315_p9, %p312_p8 }
  0x18   :  { %320 = shalt.err (!%p317_p10)
}
  0x19   :  { %s321_s6 = scalar_lea.vmem %s387_s15, 1024  ;;  %p326_p12 = scmp.lt.s32.totalorder %s387_s15, %s387_s15 }
  0x1a   :  { %p322_p11 = scmp.ne.s32.totalorder %s387_s15, %s321_s6  ;;  %p327_p13 = scmp.lt.s32.totalorder %s321_s6, %s321_s6 }
  0x1c   :  { %p328_p0 = por %p327_p13, %p326_p12 }
  0x1e   :  { %p329_p1 = pnand %p328_p0, %p322_p11 }
  0x20   :  { %332 = shalt.err (!%p329_p1)
}
  0x21   :  { %s363_s0 = smov 256   ;;  %s364_s7 = smov 16  }
  0x22   :  { %32 = dma.hbm_to_vmem [thread:$0]  %s437_s1, 1024, %s387_s15, [#allocation6], %s363_s0, %s363_s0, %s364_s7  }
  0x23   :  { %355 = dma.done.wait [#allocation3], 128  }
  0x24   :  { %356 = vsyncadd [#allocation3], 4294967168 }
  0x25   :  { %357 = dma.done.wait [#allocation6], 1024  }
  0x26   :  { %358 = vsyncadd [#allocation6], 4294966272  ;;  %v42_v0 = vld [vmem:[#allocation2] sm:$0xff]  ;;  %vm44_vm0 = vcmask 261120   ;;  %v275_v3 = vld [vmem:[#allocation5 + $0x4] ss:$16 sps:$4 sm:$0xff]   ;;  %v64_v18 = vlaneseq }
  0x27   :  { %v43_v1 = vmul.f32 %v42_v0, %v42_v0  ;;  %v277_v4 = vld [vmem:[#allocation5 + $0xc] ss:$16 sps:$4 sm:$0xff]   ;;  %v279_v5 = vld [vmem:[#allocation5] ss:$16 sps:$4 sm:$0xff]   ;;  %v280_v6 = vld [vmem:[#allocation5 + $0x8] ss:$16 sps:$4 sm:$0xff]   ;;  %127 = vmatprep.subr.bf16.mxu0 %v275_v3 }
  0x28   :  { %v281_v7 = vld [vmem:[#allocation5 + $0x24] ss:$16 sps:$4 sm:$0xff]   ;;  %v283_v8 = vld [vmem:[#allocation5 + $0x2c] ss:$16 sps:$4 sm:$0xff]   ;;  %168 = vmatprep.subr.bf16.mxu1 %v277_v4  ;;  %128 = vmatpush1.bf16.msra.mxu0 %v279_v5  ;;  %v285_v9 = vld [vmem:[#allocation5 + $0x20] ss:$16 sps:$4 sm:$0xff]  }
  0x29   :  { %v45_v2 = vsel %vm44_vm0, %v43_v1, 0.0  ;;  %169 = vmatpush1.bf16.msra.mxu1 %v280_v6  ;;  %v286_v10 = vld [vmem:[#allocation5 + $0x28] ss:$16 sps:$4 sm:$0xff]   ;;  %129 = vmatprep.subr.bf16.mxu0 %v281_v7  ;;  %v365_v11 = vmov 0   ;;  %v65_v19 = vshrl.u32 %v64_v18, 7  ;;  %s366_s11 = smov [#allocation7]  }
  0x2a   :  { %46 = vadd.xlane.f32.xlu0 %v45_v2  ;;  %170 = vmatprep.subr.bf16.mxu1 %v283_v8  ;;  %v62_v22 = vld [vmem:[%s438_s2] sm:$0xf]  ;;  %s245_s12 = sshll.u32 %s366_s11, 4  ;;  %s246_s12 = int_to_ptr.vmem [resolvable:$true] %s245_s12 }
  0x2b   :  { %159 = vmatprep.mubr.bf16.mxu0 %v365_v11  ;;  %200 = vmatprep.mubr.bf16.mxu1 %v365_v11  ;;  %v66_v20 = vsub.s32 0, %v65_v19  ;;  %v74_v21 = vsub.s32 2, %v65_v19  ;;  %v70_v23 = vsub.s32 1, %v65_v19  ;;  %v78_v24 = vsub.s32 3, %v65_v19  ;;  %s333_s2 = scalar_lea.vmem %s246_s12, 256  ;;  %p338_p3 = scmp.lt.s32.totalorder %s246_s12, %s246_s12 }
  0x2c   :  { %130 = vmatpush1.bf16.msra.mxu0 %v285_v9  ;;  %p334_p2 = scmp.ne.s32.totalorder %s246_s12, %s333_s2  ;;  %p339_p4 = scmp.lt.s32.totalorder %s333_s2, %s333_s2 }
  0x2d   :  { %171 = vmatpush1.bf16.msra.mxu1 %v286_v10  ;;  %v67_v25 = vrot.slane %v62_v22, %v66_v20  ;;  %v75_v26 = vrot.slane %v62_v22, %v74_v21  ;;  %v71_v27 = vrot.slane %v62_v22, %v70_v23  ;;  %v79_v28 = vrot.slane %v62_v22, %v78_v24 }
  0x2e   :  { %p340_p5 = por %p339_p4, %p338_p3 }
  0x30   :  { %p341_p6 = pnand %p340_p5, %p334_p2 }
  0xb7   :  { %v47_v12 = vpop.xlane.xlu0 %46 }
  0xb8   :  { %v49_v13 = vmul.f32 0.03125, %v47_v12 }
  0xba   :  { %v50_v14 = vadd.f32 1e-08, %v49_v13 }
  0xbc   :  { %287 = vrsqrt.f32 %v50_v14 }
  0xc6   :  { %v288_v15 = vpop.eup %287 }
  0xc7   :  { %v52_v16 = vmul.f32 %v288_v15, %v42_v0 }
  0xc9   :  { %v53_v17 = vpack.c.bf16 %v52_v16, %v52_v16 }
  0xcb   :  { %263 = vmatmul.mubr.msk.bf16.vlgmr.msra.gmra.mrb[0].mxu0 %vm44_vm0, %v53_v17  ;;  %264 = vmatmul.mubr.msk.bf16.vlgmr.msra.gmra.mrb[0].mxu1 %vm44_vm0, %v53_v17 }
 0x19e   :  { %v161_v29 = vpop.f32.mrb[0].mxu0  ;;  %v202_v30 = vpop.f32.mrb[0].mxu1 }
 0x19f   :  { %v162_v31 = vadd.f32 %v161_v29, %v67_v25  ;;  %v203_v32 = vadd.f32 %v202_v30, %v75_v26  ;;  %v163_v33 = vpop.f32.mrb[1].mxu0  ;;  %v204_v34 = vpop.f32.mrb[1].mxu1 }
 0x1a0   :  { %v164_v35 = vadd.f32 %v163_v33, %v71_v27  ;;  %v205_v36 = vadd.f32 %v204_v34, %v79_v28  ;;  %v165_v37 = vpop.f32.mrb[2].mxu0  ;;  %v206_v38 = vpop.f32.mrb[2].mxu1 }
 0x1a1   :  { %vm209_vm1 = vcmp.ge.f32.partialorder %v162_v31, 0.0  ;;  %v213_v39 = vmul.f32 0.2, %v162_v31  ;;  %vm211_vm2 = vcmp.ge.f32.partialorder %v203_v32, 0.0  ;;  %v215_v40 = vmul.f32 0.2, %v203_v32 }
 0x1a2   :  { %vm210_vm3 = vcmp.ge.f32.partialorder %v164_v35, 0.0  ;;  %v214_v41 = vmul.f32 0.2, %v164_v35  ;;  %vm212_vm4 = vcmp.ge.f32.partialorder %v205_v36, 0.0  ;;  %v216_v42 = vmul.f32 0.2, %v205_v36 }
 0x1a3   :  { %v217_v43 = vsel %vm209_vm1, %v162_v31, %v213_v39  ;;  %v219_v44 = vsel %vm211_vm2, %v203_v32, %v215_v40  ;;  %v166_v45 = vpop.f32.mrb[3].mxu0  ;;  %v207_v46 = vpop.f32.mrb[3].mxu1 }
 0x1a4   :  { %v218_v47 = vsel %vm210_vm3, %v164_v35, %v214_v41  ;;  %v220_v48 = vsel %vm212_vm4, %v205_v36, %v216_v42 }
 0x1a5   :  { %v267_v49 = vpack.c.bf16 %v218_v47, %v217_v43  ;;  %v268_v50 = vpack.c.bf16 %v220_v48, %v219_v44 }
 0x1a7   :  { %237 = vst [vmem:[#allocation7] sm:$0xff] %v267_v49  ;;  %238 = vst [vmem:[#allocation7 + $0x8] sm:$0xff] %v268_v50 }
 0x1a8   :  { %344 = shalt.err (!%p341_p6)
}
 0x1a9   :  { %s345_s15 = scalar_lea.hbm %s439_s3, 256 }
 0x1aa   :  { %p346_p7 = scmp.ne.s32.totalorder %s439_s3, %s345_s15  ;;  %p349_p8 = scmp.lt.u32.totalorder %s345_s15, %s439_s3 }
 0x1ac   :  { %p351_p9 = pnand %p349_p8, %p346_p7 }
 0x1ae   :  { %354 = shalt.err (!%p351_p9)
}
 0x1af   :  { %248 = dma.vmem_to_hbm [thread:$0]  %s246_s12, 256, %s439_s3, [#allocation4]  }
 0x1b0   :  { %359 = dma.done.wait [#allocation4], 256  }
 0x1b1   :  { %360 = vsyncadd [#allocation4], 4294967040 }
 0x1b2   :  { %252 = vsyncpa [#allocation3], 1 }
 0x1b3   :  { %253 = vsyncpa [#allocation6], 1 }
 0x1b4   :  { %254 = vsyncpa [#allocation4], 1 }

</bundles_post_ra>
